<compile_context>
chip_gen: v5e
topology: v5e:2x2
jax: 0.10.0
libtpu: 0.0.40
codegen_flags: <defaults>
</compile_context>

<pallas_src>
import jax
import jax.numpy as jnp
from jax.experimental import pallas as pl
from jax.experimental.pallas import tpu as pltpu


def _mask_kernel(keep_ref, x_ref, o_ref):
    # keep_ref: (1, TILE_D) float32 0/1 keep flags, broadcast over rows.
    # Select so masked columns are written as exact zeros (torch semantics).
    keep = keep_ref[...] != 0.0
    o_ref[...] = jnp.where(keep, x_ref[...], jnp.zeros_like(x_ref[...]))


def _cdiv(a, b):
    return -(-a // b)


def _round_up(v, m):
    return ((v + m - 1) // m) * m


def _round_down(v, m):
    return max(m, (v // m) * m)


def _vmem_config():
    """Returns (pipeline-buffer budget, vmem_limit_bytes), generation aware."""
    vmem_cap = None
    try:
        info = pltpu.get_tpu_info()
        vmem_cap = getattr(info, "vmem_capacity_bytes", None)
    except Exception:
        vmem_cap = None
    if vmem_cap is None:
        vmem_cap = 64 * 1024 * 1024          # assume smallest (v7x per-TC)
    if vmem_cap >= 96 * 1024 * 1024:         # v5e / v6e: 128 MiB VMEM
        return 40 * 1024 * 1024, 96 * 1024 * 1024
    # v7x: 64 MiB per TensorCore -> stay well under physical.
    return 20 * 1024 * 1024, 48 * 1024 * 1024


def _fold_factor(n, d, cap_lanes=16384):
    """Fold (N, D) -> (N//k, k*D) so the lane (last) dim is wide and, when
    possible, a multiple of 128 -> unmasked lane-dense stores, bigger DMAs.
    Pure row-major view; keep mask is tiled k times to match."""
    if d % 128 == 0 and d >= 1024:
        return 1
    max_k = max(1, min(n, cap_lanes // max(1, d)))
    best = 1
    for k in range(max_k, 1, -1):
        if n % k == 0:
            if (k * d) % 128 == 0:
                return k
            if best == 1:
                best = k
    return best


def _pick_tiles(n, d, itemsize, budget):
    """Choose (tile_n, tile_d) for the (n, d) matrix given a pipeline-buffer
    byte budget (covers 2x input + 2x output double-buffers)."""
    lane = 128
    sub = max(8, 32 // max(1, itemsize))     # f32 -> 8, bf16 -> 16, int8 -> 32
    buf_budget = max(1, budget // 4)         # bytes per single buffer

    # Lane dim: prefer full D (keep row fetched exactly once, contiguous DMAs).
    if d <= lane or d * sub * itemsize <= buf_budget:
        tile_d = d
    else:
        # Very wide D: block it in lane-dense 128-multiples (slow grid axis).
        tile_d = min(d, _round_down(buf_budget // (sub * itemsize), lane))

    # Sublane dim: byte-based, fill the per-buffer budget (multi-MiB tiles).
    rows = max(sub, buf_budget // max(1, tile_d * itemsize))
    tile_n = min(n, rows)

    if tile_n >= n:
        # Whole N fits in one tile; split in two balanced halves when the
        # array is big enough for v7x's two TensorCores to matter.
        if n >= 2 * sub and n * d * itemsize >= (4 << 20):
            tile_n = min(n, _round_up(_cdiv(n, 2), sub))
        return tile_n, tile_d

    tile_n = _round_down(tile_n, sub)
    # Megacore balance: even number of N-steps so both cores get equal work.
    steps = _cdiv(n, tile_n)
    if steps > 1 and steps % 2 == 1:
        tile_n = min(tile_n, _round_up(_cdiv(n, steps + 1), sub))
    return tile_n, tile_d


def node_feature_masking(x, y, edge_index, key, p=0.15,
                         use_pallas=None, donate_x=False):
    """Returns (x_masked, y, edge_index) mimicking NodeFeatureMasking_induct.

    donate_x=True aliases x to the output (input_output_aliases) -- use it
    whenever the caller no longer needs the un-masked features; the original
    x buffer must not be reused afterwards.
    """
    n, d = x.shape
    # Per-column uniform draws, like torch.empty((d,)).uniform_(0, 1) < p.
    u = jax.random.uniform(key, (d,), dtype=jnp.float32)
    keep = (u >= p).astype(jnp.float32)[None, :]          # (1, d) 0/1 keep flags

    itemsize = jnp.dtype(x.dtype).itemsize
    if use_pallas is None:
        # Small problems: a fused XLA select already hits roofline and avoids
        # pallas_call launch + grid-step overhead.
        use_pallas = (n * d * itemsize) >= (8 << 20)

    if not use_pallas:
        return jnp.where(keep != 0.0, x, jnp.zeros_like(x)), y, edge_index

    # Lane-dense folding for small / non-128-multiple D (row-major view).
    k = _fold_factor(n, d)
    n2, d2 = n // k, d * k
    x2 = x.reshape(n2, d2) if k > 1 else x
    keep2 = jnp.tile(keep, (1, k)) if k > 1 else keep

    budget, vmem_limit = _vmem_config()
    tile_n, tile_d = _pick_tiles(n2, d2, itemsize, budget)
    # D is the SLOW grid axis: the (1, tile_d) keep block index only changes
    # when the D block changes, so it is not re-DMAed every step.
    grid = (_cdiv(d2, tile_d), _cdiv(n2, tile_n))

    extra_kwargs = {}
    if donate_x:
        extra_kwargs["input_output_aliases"] = {1: 0}      # keep=0, x=1

    x2_masked = pl.pallas_call(
        _mask_kernel,
        out_shape=jax.ShapeDtypeStruct((n2, d2), x.dtype),
        grid_spec=pltpu.PrefetchScalarGridSpec(
            num_scalar_prefetch=0,
            grid=grid,
            in_specs=[
                pl.BlockSpec((1, tile_d), lambda j, i: (0, j)),       # keep row
                pl.BlockSpec((tile_n, tile_d), lambda j, i: (i, j)),  # node tile
            ],
            out_specs=pl.BlockSpec((tile_n, tile_d), lambda j, i: (i, j)),
        ),
        compiler_params=pltpu.CompilerParams(
            dimension_semantics=("parallel", "parallel"),
            vmem_limit_bytes=vmem_limit,
        ),
        **extra_kwargs,
    )(keep2, x2)

    x_masked = x2_masked.reshape(n, d) if k > 1 else x2_masked

    # y and edge_index are passed through unchanged.
    # TODO(synk): torch_geometric Data container construction has no Pallas
    # equivalent; outputs are returned as a plain tuple.
    return x_masked, y, edge_index


if __name__ == "__main__":
    key = jax.random.PRNGKey(0)
    kx, ky, ke, kmask = jax.random.split(key, 4)

    # Small graph: 256 nodes, 128-dim features, 512 edges.
    n, d, e = 256, 128, 512
    x = jax.random.normal(kx, (n, d), dtype=jnp.float32)
    y = jax.random.randint(ky, (n,), 0, 7, dtype=jnp.int32)
    edge_index = jax.random.randint(ke, (2, e), 0, n, dtype=jnp.int32)

    # Force the Pallas path even though this test problem is tiny.
    x_out, y_out, edge_out = node_feature_masking(
        x, y, edge_index, kmask, p=0.15, use_pallas=True)
    jax.block_until_ready(x_out)

    # Reference in plain JAX (same mask draw as the wrapper).
    u = jax.random.uniform(kmask, (d,), dtype=jnp.float32)
    x_ref = jnp.where((u >= 0.15)[None, :], x, jnp.zeros_like(x))
    assert jnp.array_equal(x_out, x_ref), "mismatch vs reference"
    assert x_out.shape == (n, d)
    assert y_out.shape == (n,) and edge_out.shape == (2, e)

    print("KERNEL_OK")
</pallas_src>

<mosaic_0001>
module attributes {stable_mosaic.version = 11 : i64} {
  func.func @_mask_kernel(%arg0: i32, %arg1: i32, %arg2: memref<1x16384xf32, #tpu.memory_space<vmem>>, %arg3: memref<2x16384xf32, #tpu.memory_space<vmem>>, %arg4: memref<2x16384xf32, #tpu.memory_space<vmem>>) attributes {dimension_semantics = [#tpu.dimension_semantics<parallel>, #tpu.dimension_semantics<parallel>], iteration_bounds = array<i64: 1, 1>, scalar_prefetch = 0 : i64, scratch_operands = 0 : i64, tpu.core_type = #tpu.core_type<tc>, window_params = [{transform_indices = @transform_0, window_bounds = array<i64: 1, 16384>}, {transform_indices = @transform_1, window_bounds = array<i64: 2, 16384>}, {transform_indices = @transform_2, window_bounds = array<i64: 2, 16384>}]} {
    %c0 = arith.constant 0 : index
    %c0_0 = arith.constant 0 : index
    %0 = vector.load %arg2[%c0, %c0_0] : memref<1x16384xf32, #tpu.memory_space<vmem>>, vector<1x16384xf32>
    %cst = arith.constant 0.000000e+00 : f32
    %1 = vector.broadcast %cst : f32 to vector<1x16384xf32>
    %2 = arith.cmpf one, %0, %1 : vector<1x16384xf32>
    %c0_1 = arith.constant 0 : index
    %c0_2 = arith.constant 0 : index
    %3 = vector.load %arg3[%c0_1, %c0_2] : memref<2x16384xf32, #tpu.memory_space<vmem>>, vector<2x16384xf32>
    %cst_3 = arith.constant 0.000000e+00 : f32
    %4 = vector.broadcast %cst_3 : f32 to vector<2x16384xf32>
    %5 = vector.shape_cast %2 : vector<1x16384xi1> to vector<1x16384xi1>
    %6 = vector.broadcast %5 : vector<1x16384xi1> to vector<2x16384xi1>
    %7 = arith.select %6, %3, %4 : vector<2x16384xi1>, vector<2x16384xf32>
    %c0_4 = arith.constant 0 : index
    %c0_5 = arith.constant 0 : index
    %8 = vector.load %arg4[%c0_4, %c0_5] : memref<2x16384xf32, #tpu.memory_space<vmem>>, vector<2x16384xf32>
    tpu.vector_store %arg4[%c0_4, %c0_5], %7 {strides = array<i32>} : memref<2x16384xf32, #tpu.memory_space<vmem>>, vector<2x16384xf32>,
    return
  }
  func.func @transform_0(%arg0: i32, %arg1: i32) -> (i32, i32) {
    %c0_i32 = arith.constant 0 : i32
    %c0_i32_0 = arith.constant 0 : i32
    return %c0_i32, %arg0 : i32, i32
  }
  func.func @transform_1(%arg0: i32, %arg1: i32) -> (i32, i32) {
    %c0_i32 = arith.constant 0 : i32
    return %arg1, %arg0 : i32, i32
  }
  func.func @transform_2(%arg0: i32, %arg1: i32) -> (i32, i32) {
    %c0_i32 = arith.constant 0 : i32
    return %arg1, %arg0 : i32, i32
  }
}

</mosaic_0001>

<bundles_post_ra>
// kernel: tpu_custom_call.1
= control target key start
LH: loop header
LB: loop body
LE: loop exit
PB: predicated region body
PF: predicated region fallthrough
CT: control target
= control target key end

     0   :  { %7 = vsyncpa [#allocation3], 0  ;;  %s1920_s0 = inlined_call_operand.hbm [shape: f32[1,16384], index: 0, kind: input, shape index: {}]   ;;  %s1921_s1 = inlined_call_operand.hbm [shape: f32[2,16384], index: 1, kind: input, shape index: {}]   ;;  %s1922_s2 = inlined_call_operand.hbm [shape: f32[2,16384], index: 2, kind: output, shape index: {}]  }
   0x1   :  { %8 = vsyncpa [#allocation6], 0 }
   0x2   :  { %9 = vsyncpa [#allocation4], 0  ;;  %s15_s11 = sshll.u32 %s1920_s0, 4  ;;  %s1312_s12 = smov [#allocation2]   ;;  %s16_s11 = int_to_ptr.hbm [resolvable:$true] %s15_s11 }
   0x3   :  { %s17_s13 = sshll.u32 %s1312_s12, 4  ;;  %s26_s16 = sshll.u32 %s1921_s1, 4  ;;  %s18_s13 = int_to_ptr.vmem [resolvable:$true] %s17_s13  ;;  %s27_s16 = int_to_ptr.hbm [resolvable:$true] %s26_s16 }
   0x4   :  { %20 = dma.hbm_to_vmem [thread:$0]  %s16_s11, 2048, %s18_s13, [#allocation3]  }
   0x5   :  { %s1313_s17 = smov [#allocation5]  }
   0x6   :  { %s28_s18 = sshll.u32 %s1313_s17, 4  ;;  %s29_s18 = int_to_ptr.vmem [resolvable:$true] %s28_s18 }
   0x7   :  { %31 = dma.hbm_to_vmem [thread:$0]  %s27_s16, 4096, %s29_s18, [#allocation6]  }
   0x8   :  { %1306 = dma.done.wait [#allocation3], 2048  }
   0x9   :  { %1307 = vsyncadd [#allocation3], 4294965248 }
   0xa   :  { %1308 = dma.done.wait [#allocation6], 4096  }
   0xb   :  { %1309 = vsyncadd [#allocation6], 4294963200  ;;  %v72_v0 = vld [vmem:[#allocation5] sm:$0xff]  ;;  %v73_v1 = vld [vmem:[#allocation5 + $0x8] sm:$0xff]  ;;  %v1314_v4 = vmov 0   ;;  %vm1049_vm2 = vcmask 1041408  }
   0xc   :  { %408 = vst [vmem:[#allocation1] ss:$4 sm:$0xff] %v72_v0  ;;  %v40_v2 = vld [vmem:[#allocation2] sm:$0xff]  ;;  %v41_v3 = vld [vmem:[#allocation2 + $0x8] sm:$0xff]  ;;  %vm1051_vm3 = vcmask 1045508   ;;  %vm1053_vm4 = vcmask 1043456  }
   0xd   :  { %410 = vst [vmem:[#allocation1 + $0x20] ss:$4 sm:$0xff] %v73_v1  ;;  %vm56_vm0 = vcmp.ne.f32.partialorder %v40_v2, 0.0  ;;  %vm57_vm1 = vcmp.ne.f32.partialorder %v41_v3, 0.0  ;;  %v74_v18 = vld [vmem:[#allocation5 + $0x10] sm:$0xff]  ;;  %v75_v25 = vld [vmem:[#allocation5 + $0x18] sm:$0xff] }
   0xe   :  { %v104_v5 = vsel %vm56_vm0, 1, %v1314_v4  ;;  %v105_v43 = vsel %vm57_vm1, 1, %v1314_v4  ;;  %v42_v60 = vld [vmem:[#allocation2 + $0x10] sm:$0xff]  ;;  %v76_v63 = vld [vmem:[#allocation5 + $0x20] sm:$0xff]  ;;  %v77_v3 = vld [vmem:[#allocation5 + $0x28] sm:$0xff]  ;;  %s1315_s0 = smov [#allocation7]  }
   0xf   :  { %v120_v6 = vperm.slane %v104_v5, 0  ;;  %v121_v7 = vperm.slane %v104_v5, 1  ;;  %v122_v8 = vperm.slane %v104_v5, 2  ;;  %v123_v9 = vperm.slane %v104_v5, 3  ;;  %s1217_s1 = sshll.u32 %s1315_s0, 4  ;;  %s1219_s21 = sshll.u32 %s1922_s2, 4  ;;  %s1218_s1 = int_to_ptr.vmem [resolvable:$true] %s1217_s1  ;;  %s1220_s21 = int_to_ptr.hbm [resolvable:$true] %s1219_s21 }
  0x10   :  { %v124_v10 = vperm.slane %v104_v5, 4  ;;  %v125_v11 = vperm.slane %v104_v5, 5  ;;  %v126_v12 = vperm.slane %v104_v5, 6  ;;  %v127_v13 = vperm.slane %v104_v5, 7 }
  0x11   :  { %vm1338_vm5 = vcmp.eq.s32.totalorder %v120_v6, 1  ;;  %vm1342_vm6 = vcmp.eq.s32.totalorder %v121_v7, 1  ;;  %vm1346_vm7 = vcmp.eq.s32.totalorder %v122_v8, 1  ;;  %vm1350_vm8 = vcmp.eq.s32.totalorder %v123_v9, 1 }
  0x12   :  { %vm1354_vm9 = vcmp.eq.s32.totalorder %v124_v10, 1  ;;  %vm1358_vm10 = vcmp.eq.s32.totalorder %v125_v11, 1  ;;  %vm1362_vm11 = vcmp.eq.s32.totalorder %v126_v12, 1  ;;  %vm1366_vm12 = vcmp.eq.s32.totalorder %v127_v13, 1 }
  0x13   :  { %v411_v23 = vld.sshfl [vmem:[#allocation1] sm:$0xff pattern:$0x73625140]  ;;  %v412_v24 = vld.sshfl [vmem:[#allocation1 + $0x8] sm:$0xff pattern:$0x73625140] }
  0x14   :  { %v413_v26 = vld.sshfl [vmem:[#allocation1 + $0x10] sm:$0xff pattern:$0x73625140]  ;;  %v414_v27 = vld.sshfl [vmem:[#allocation1 + $0x18] sm:$0xff pattern:$0x73625140] }
  0x15   :  { %v415_v28 = vld.sshfl [vmem:[#allocation1 + $0x20] sm:$0xff pattern:$0x73625140]  ;;  %v416_v29 = vld.sshfl [vmem:[#allocation1 + $0x28] sm:$0xff pattern:$0x73625140] }
  0x16   :  { %v417_v30 = vld.sshfl [vmem:[#allocation1 + $0x30] sm:$0xff pattern:$0x73625140]  ;;  %v418_v31 = vld.sshfl [vmem:[#allocation1 + $0x38] sm:$0xff pattern:$0x73625140] }
  0x17   :  { %419 = vst [vmem:[#allocation1] ss:$4 sm:$0xff] %v74_v18  ;;  %v697_v32 = vsel %vm1338_vm5, %v411_v23, 0.0  ;;  %v698_v33 = vsel %vm1342_vm6, %v412_v24, 0.0  ;;  %v699_v34 = vsel %vm1346_vm7, %v413_v26, 0.0  ;;  %v700_v35 = vsel %vm1350_vm8, %v414_v27, 0.0 }
  0x18   :  { %420 = vst [vmem:[#allocation1 + $0x20] ss:$4 sm:$0xff] %v75_v25  ;;  %v953_v36 = vrot.slane %v698_v33, 6  ;;  %v954_v37 = vrot.slane %v699_v34, 4  ;;  %v955_v38 = vrot.slane %v700_v35, 2  ;;  %v701_v39 = vsel %vm1354_vm9, %v415_v28, 0.0 }
  0x19   :  { %v702_v40 = vsel %vm1358_vm10, %v416_v29, 0.0  ;;  %v703_v41 = vsel %vm1362_vm11, %v417_v30, 0.0  ;;  %v704_v42 = vsel %vm1366_vm12, %v418_v31, 0.0  ;;  %v128_v50 = vperm.slane %v105_v43, 0 }
  0x1a   :  { %v1050_v44 = vsel %vm1049_vm2, %v697_v32, %v953_v36  ;;  %v1052_v45 = vsel %vm1051_vm3, %v954_v37, %v955_v38  ;;  %v956_v46 = vrot.slane %v702_v40, 6  ;;  %v957_v47 = vrot.slane %v703_v41, 4  ;;  %v78_v37 = vld [vmem:[#allocation5 + $0x30] sm:$0xff]  ;;  %v43_v38 = vld [vmem:[#allocation2 + $0x18] sm:$0xff] }
  0x1b   :  { %v1054_v48 = vsel %vm1053_vm4, %v1050_v44, %v1052_v45  ;;  %v958_v49 = vrot.slane %v704_v42, 2  ;;  %v129_v51 = vperm.slane %v105_v43, 1  ;;  %v130_v53 = vperm.slane %v105_v43, 2  ;;  %v79_v42 = vld [vmem:[#allocation5 + $0x38] sm:$0xff] }
  0x1c   :  { %1180 = vst [vmem:[#allocation7] sm:$0xff] %v1054_v48  ;;  %v1055_v52 = vsel %vm1049_vm2, %v701_v39, %v956_v46  ;;  %v131_v54 = vperm.slane %v105_v43, 3  ;;  %v132_v55 = vperm.slane %v105_v43, 4  ;;  %vm1393_vm13 = vcmp.eq.s32.totalorder %v128_v50, 1 }
  0x1d   :  { %v1056_v56 = vsel %vm1051_vm3, %v957_v47, %v958_v49  ;;  %vm1397_vm14 = vcmp.eq.s32.totalorder %v129_v51, 1  ;;  %v133_v59 = vperm.slane %v105_v43, 5  ;;  %vm258_vm15 = vcmp.eq.s32.totalorder %v130_v53, 1 }
  0x1e   :  { %v421_v61 = vld.sshfl [vmem:[#allocation1] sm:$0xff pattern:$0x73625140]  ;;  %v422_v62 = vld.sshfl [vmem:[#allocation1 + $0x8] sm:$0xff pattern:$0x73625140]  ;;  %v1057_v2 = vsel %vm1053_vm4, %v1055_v52, %v1056_v56 }
  0x1f   :  { %v423_v0 = vld.sshfl [vmem:[#allocation1 + $0x10] sm:$0xff pattern:$0x73625140]  ;;  %v424_v1 = vld.sshfl [vmem:[#allocation1 + $0x18] sm:$0xff pattern:$0x73625140] }
  0x20   :  { %v425_v5 = vld.sshfl [vmem:[#allocation1 + $0x20] sm:$0xff pattern:$0x73625140]  ;;  %v426_v6 = vld.sshfl [vmem:[#allocation1 + $0x28] sm:$0xff pattern:$0x73625140] }
  0x21   :  { %v427_v7 = vld.sshfl [vmem:[#allocation1 + $0x30] sm:$0xff pattern:$0x73625140]  ;;  %v428_v8 = vld.sshfl [vmem:[#allocation1 + $0x38] sm:$0xff pattern:$0x73625140] }
  0x22   :  { %1181 = vst [vmem:[#allocation7 + $0x8] sm:$0xff] %v1057_v2  ;;  %vm259_vm0 = vcmp.eq.s32.totalorder %v131_v54, 1  ;;  %v706_v9 = vsel %vm1397_vm14, %v422_v62, 0.0  ;;  %vm58_vm1 = vcmp.ne.f32.partialorder %v42_v60, 0.0  ;;  %v707_v10 = vsel %vm258_vm15, %v423_v0, 0.0 }
  0x23   :  { %429 = vst [vmem:[#allocation1] ss:$4 sm:$0xff] %v76_v63  ;;  %v708_v11 = vsel %vm259_vm0, %v424_v1, 0.0  ;;  %v959_v12 = vrot.slane %v706_v9, 6  ;;  %v134_v13 = vperm.slane %v105_v43, 6  ;;  %v705_v14 = vsel %vm1393_vm13, %v421_v61, 0.0 }
  0x24   :  { %430 = vst [vmem:[#allocation1 + $0x20] ss:$4 sm:$0xff] %v77_v3  ;;  %v960_v15 = vrot.slane %v707_v10, 4  ;;  %v961_v16 = vrot.slane %v708_v11, 2  ;;  %v135_v17 = vperm.slane %v105_v43, 7  ;;  %vm1407_vm5 = vcmp.eq.s32.totalorder %v132_v55, 1 }
  0x25   :  { %v1058_v18 = vsel %vm1049_vm2, %v705_v14, %v959_v12  ;;  %vm261_vm6 = vcmp.eq.s32.totalorder %v133_v59, 1  ;;  %vm262_vm7 = vcmp.eq.s32.totalorder %v134_v13, 1  ;;  %v709_v27 = vsel %vm1407_vm5, %v425_v5, 0.0  ;;  %v44_v9 = vld [vmem:[#allocation2 + $0x20] sm:$0xff] }
  0x26   :  { %v1059_v20 = vsel %vm1051_vm3, %v960_v15, %v961_v16  ;;  %vm263_vm8 = vcmp.eq.s32.totalorder %v135_v17, 1  ;;  %v710_v21 = vsel %vm261_vm6, %v426_v6, 0.0  ;;  %v711_v22 = vsel %vm262_vm7, %v427_v7, 0.0  ;;  %v80_v16 = vld [vmem:[#allocation5 + $0x40] sm:$0xff] }
  0x27   :  { %v1060_v23 = vsel %vm1053_vm4, %v1058_v18, %v1059_v20  ;;  %v712_v24 = vsel %vm263_vm8, %v428_v8, 0.0  ;;  %v962_v25 = vrot.slane %v710_v21, 6  ;;  %v963_v26 = vrot.slane %v711_v22, 4  ;;  %v81_v22 = vld [vmem:[#allocation5 + $0x48] sm:$0xff] }
  0x28   :  { %1182 = vst [vmem:[#allocation7 + $0x10] sm:$0xff] %v1060_v23  ;;  %v964_v28 = vrot.slane %v712_v24, 2  ;;  %v106_v29 = vsel %vm58_vm1, 1, %v1314_v4  ;;  %vm59_vm12 = vcmp.ne.f32.partialorder %v43_v38, 0.0  ;;  %vm60_vm6 = vcmp.ne.f32.partialorder %v44_v9, 0.0 }
  0x29   :  { %v1061_v30 = vsel %vm1049_vm2, %v709_v27, %v962_v25  ;;  %v136_v31 = vperm.slane %v106_v29, 0  ;;  %v137_v32 = vperm.slane %v106_v29, 1  ;;  %v138_v33 = vperm.slane %v106_v29, 2 }
  0x2a   :  { %v431_v34 = vld.sshfl [vmem:[#allocation1] sm:$0xff pattern:$0x73625140]  ;;  %v432_v35 = vld.sshfl [vmem:[#allocation1 + $0x8] sm:$0xff pattern:$0x73625140]  ;;  %v1062_v36 = vsel %vm1051_vm3, %v963_v26, %v964_v28 }
  0x2b   :  { %v433_v39 = vld.sshfl [vmem:[#allocation1 + $0x10] sm:$0xff pattern:$0x73625140]  ;;  %v434_v40 = vld.sshfl [vmem:[#allocation1 + $0x18] sm:$0xff pattern:$0x73625140]  ;;  %v1063_v41 = vsel %vm1053_vm4, %v1061_v30, %v1062_v36 }
  0x2c   :  { %v435_v43 = vld.sshfl [vmem:[#allocation1 + $0x20] sm:$0xff pattern:$0x73625140]  ;;  %v436_v44 = vld.sshfl [vmem:[#allocation1 + $0x28] sm:$0xff pattern:$0x73625140] }
  0x2d   :  { %v437_v45 = vld.sshfl [vmem:[#allocation1 + $0x30] sm:$0xff pattern:$0x73625140]  ;;  %v438_v46 = vld.sshfl [vmem:[#allocation1 + $0x38] sm:$0xff pattern:$0x73625140] }
  0x2e   :  { %1183 = vst [vmem:[#allocation7 + $0x18] sm:$0xff] %v1063_v41  ;;  %v139_v47 = vperm.slane %v106_v29, 3  ;;  %vm1420_vm9 = vcmp.eq.s32.totalorder %v136_v31, 1  ;;  %vm265_vm10 = vcmp.eq.s32.totalorder %v137_v32, 1  ;;  %vm266_vm11 = vcmp.eq.s32.totalorder %v138_v33, 1 }
  0x2f   :  { %439 = vst [vmem:[#allocation1] ss:$4 sm:$0xff] %v78_v37  ;;  %v714_v49 = vsel %vm265_vm10, %v432_v35, 0.0  ;;  %v715_v50 = vsel %vm266_vm11, %v433_v39, 0.0  ;;  %v140_v51 = vperm.slane %v106_v29, 4  ;;  %v141_v54 = vperm.slane %v106_v29, 5 }
  0x30   :  { %440 = vst [vmem:[#allocation1 + $0x20] ss:$4 sm:$0xff] %v79_v42  ;;  %vm267_vm13 = vcmp.eq.s32.totalorder %v139_v47, 1  ;;  %v965_v52 = vrot.slane %v714_v49, 6  ;;  %v966_v53 = vrot.slane %v715_v50, 4  ;;  %v713_v55 = vsel %vm1420_vm9, %v431_v34, 0.0 }
  0x31   :  { %v716_v56 = vsel %vm267_vm13, %v434_v40, 0.0  ;;  %v142_v57 = vperm.slane %v106_v29, 6  ;;  %v143_v58 = vperm.slane %v106_v29, 7  ;;  %vm268_vm14 = vcmp.eq.s32.totalorder %v140_v51, 1 }
  0x32   :  { %v967_v59 = vrot.slane %v716_v56, 2  ;;  %v1064_v60 = vsel %vm1049_vm2, %v713_v55, %v965_v52  ;;  %vm269_vm15 = vcmp.eq.s32.totalorder %v141_v54, 1  ;;  %v107_v62 = vsel %vm59_vm12, 1, %v1314_v4  ;;  %v82_v54 = vld [vmem:[#allocation5 + $0x50] sm:$0xff]  ;;  %v45_v55 = vld [vmem:[#allocation2 + $0x28] sm:$0xff] }
  0x33   :  { %vm270_vm0 = vcmp.eq.s32.totalorder %v142_v57, 1  ;;  %vm271_vm1 = vcmp.eq.s32.totalorder %v143_v58, 1  ;;  %v718_v61 = vsel %vm269_vm15, %v436_v44, 0.0  ;;  %v717_v3 = vsel %vm268_vm14, %v435_v43, 0.0 }
  0x34   :  { %v1065_v63 = vsel %vm1051_vm3, %v966_v53, %v967_v59  ;;  %v719_v0 = vsel %vm270_vm0, %v437_v45, 0.0  ;;  %v720_v1 = vsel %vm271_vm1, %v438_v46, 0.0  ;;  %v968_v2 = vrot.slane %v718_v61, 6  ;;  %v83_v59 = vld [vmem:[#allocation5 + $0x58] sm:$0xff] }
  0x35   :  { %v969_v5 = vrot.slane %v719_v0, 4  ;;  %v970_v6 = vrot.slane %v720_v1, 2  ;;  %v144_v8 = vperm.slane %v107_v62, 0  ;;  %v1066_v14 = vsel %vm1053_vm4, %v1064_v60, %v1065_v63 }
  0x36   :  { %v1067_v7 = vsel %vm1049_vm2, %v717_v3, %v968_v2  ;;  %v441_v10 = vld.sshfl [vmem:[#allocation1] sm:$0xff pattern:$0x73625140]  ;;  %v442_v11 = vld.sshfl [vmem:[#allocation1 + $0x8] sm:$0xff pattern:$0x73625140] }
  0x37   :  { %v443_v12 = vld.sshfl [vmem:[#allocation1 + $0x10] sm:$0xff pattern:$0x73625140]  ;;  %v444_v13 = vld.sshfl [vmem:[#allocation1 + $0x18] sm:$0xff pattern:$0x73625140]  ;;  %v1068_v15 = vsel %vm1051_vm3, %v969_v5, %v970_v6 }
  0x38   :  { %v445_v17 = vld.sshfl [vmem:[#allocation1 + $0x20] sm:$0xff pattern:$0x73625140]  ;;  %v446_v18 = vld.sshfl [vmem:[#allocation1 + $0x28] sm:$0xff pattern:$0x73625140]  ;;  %v1069_v19 = vsel %vm1053_vm4, %v1067_v7, %v1068_v15 }
  0x39   :  { %v447_v20 = vld.sshfl [vmem:[#allocation1 + $0x30] sm:$0xff pattern:$0x73625140]  ;;  %v448_v21 = vld.sshfl [vmem:[#allocation1 + $0x38] sm:$0xff pattern:$0x73625140] }
  0x3a   :  { %1184 = vst [vmem:[#allocation7 + $0x20] sm:$0xff] %v1066_v14  ;;  %v145_v23 = vperm.slane %v107_v62, 1  ;;  %v146_v24 = vperm.slane %v107_v62, 2  ;;  %v147_v25 = vperm.slane %v107_v62, 3  ;;  %vm1434_vm5 = vcmp.eq.s32.totalorder %v144_v8, 1  ;;  %v46_v5 = vld [vmem:[#allocation2 + $0x30] sm:$0xff] }
  0x3b   :  { %1185 = vst [vmem:[#allocation7 + $0x28] sm:$0xff] %v1069_v19  ;;  %v148_v27 = vperm.slane %v107_v62, 4  ;;  %v149_v28 = vperm.slane %v107_v62, 5  ;;  %v150_v29 = vperm.slane %v107_v62, 6  ;;  %v151_v30 = vperm.slane %v107_v62, 7 }
  0x3c   :  { %449 = vst [vmem:[#allocation1] ss:$4 sm:$0xff] %v80_v16  ;;  %vm273_vm7 = vcmp.eq.s32.totalorder %v145_v23, 1  ;;  %vm274_vm8 = vcmp.eq.s32.totalorder %v146_v24, 1  ;;  %vm275_vm9 = vcmp.eq.s32.totalorder %v147_v25, 1  ;;  %v721_v31 = vsel %vm1434_vm5, %v441_v10, 0.0 }
  0x3d   :  { %450 = vst [vmem:[#allocation1 + $0x20] ss:$4 sm:$0xff] %v81_v22  ;;  %v722_v32 = vsel %vm273_vm7, %v442_v11, 0.0  ;;  %v723_v33 = vsel %vm274_vm8, %v443_v12, 0.0  ;;  %v724_v34 = vsel %vm275_vm9, %v444_v13, 0.0  ;;  %vm277_vm10 = vcmp.eq.s32.totalorder %v149_v28, 1 }
  0x3e   :  { %v971_v35 = vrot.slane %v722_v32, 6  ;;  %v972_v36 = vrot.slane %v723_v33, 4  ;;  %v973_v37 = vrot.slane %v724_v34, 2  ;;  %vm1440_vm11 = vcmp.eq.s32.totalorder %v148_v27, 1  ;;  %v85_v34 = vld [vmem:[#allocation5 + $0x68] sm:$0xff] }
  0x3f   :  { %vm278_vm12 = vcmp.eq.s32.totalorder %v150_v29, 1  ;;  %vm279_vm13 = vcmp.eq.s32.totalorder %v151_v30, 1  ;;  %v726_v39 = vsel %vm277_vm10, %v446_v18, 0.0  ;;  %v725_v48 = vsel %vm1440_vm11, %v445_v17, 0.0  ;;  %v84_v30 = vld [vmem:[#allocation5 + $0x60] sm:$0xff] }
  0x40   :  { %v1070_v40 = vsel %vm1049_vm2, %v721_v31, %v971_v35  ;;  %v1071_v41 = vsel %vm1051_vm3, %v972_v36, %v973_v37  ;;  %v727_v42 = vsel %vm278_vm12, %v447_v20, 0.0  ;;  %v728_v43 = vsel %vm279_vm13, %v448_v21, 0.0 }
  0x41   :  { %v1072_v44 = vsel %vm1053_vm4, %v1070_v40, %v1071_v41  ;;  %v974_v45 = vrot.slane %v726_v39, 6  ;;  %v975_v46 = vrot.slane %v727_v42, 4  ;;  %v976_v47 = vrot.slane %v728_v43, 2 }
  0x42   :  { %1186 = vst [vmem:[#allocation7 + $0x30] sm:$0xff] %v1072_v44  ;;  %v108_v49 = vsel %vm60_vm6, 1, %v1314_v4  ;;  %vm61_vm14 = vcmp.ne.f32.partialorder %v45_v55, 0.0  ;;  %vm62_vm6 = vcmp.ne.f32.partialorder %v46_v5, 0.0 }
  0x43   :  { %v451_v50 = vld.sshfl [vmem:[#allocation1] sm:$0xff pattern:$0x73625140]  ;;  %v452_v51 = vld.sshfl [vmem:[#allocation1 + $0x8] sm:$0xff pattern:$0x73625140]  ;;  %v1073_v52 = vsel %vm1049_vm2, %v725_v48, %v974_v45  ;;  %v1074_v53 = vsel %vm1051_vm3, %v975_v46, %v976_v47 }
  0x44   :  { %v453_v56 = vld.sshfl [vmem:[#allocation1 + $0x10] sm:$0xff pattern:$0x73625140]  ;;  %v454_v57 = vld.sshfl [vmem:[#allocation1 + $0x18] sm:$0xff pattern:$0x73625140]  ;;  %v1075_v58 = vsel %vm1053_vm4, %v1073_v52, %v1074_v53 }
  0x45   :  { %v455_v60 = vld.sshfl [vmem:[#allocation1 + $0x20] sm:$0xff pattern:$0x73625140]  ;;  %v456_v61 = vld.sshfl [vmem:[#allocation1 + $0x28] sm:$0xff pattern:$0x73625140] }
  0x46   :  { %v457_v62 = vld.sshfl [vmem:[#allocation1 + $0x30] sm:$0xff pattern:$0x73625140]  ;;  %v458_v63 = vld.sshfl [vmem:[#allocation1 + $0x38] sm:$0xff pattern:$0x73625140] }
  0x47   :  { %1187 = vst [vmem:[#allocation7 + $0x38] sm:$0xff] %v1075_v58  ;;  %v152_v0 = vperm.slane %v108_v49, 0  ;;  %v153_v1 = vperm.slane %v108_v49, 1  ;;  %v154_v2 = vperm.slane %v108_v49, 2  ;;  %v155_v3 = vperm.slane %v108_v49, 3 }
  0x48   :  { %459 = vst [vmem:[#allocation1] ss:$4 sm:$0xff] %v82_v54  ;;  %v156_v6 = vperm.slane %v108_v49, 4  ;;  %v157_v7 = vperm.slane %v108_v49, 5  ;;  %v158_v8 = vperm.slane %v108_v49, 6  ;;  %v159_v9 = vperm.slane %v108_v49, 7 }
  0x49   :  { %460 = vst [vmem:[#allocation1 + $0x20] ss:$4 sm:$0xff] %v83_v59  ;;  %vm1454_vm15 = vcmp.eq.s32.totalorder %v152_v0, 1  ;;  %vm281_vm0 = vcmp.eq.s32.totalorder %v153_v1, 1  ;;  %vm282_vm1 = vcmp.eq.s32.totalorder %v154_v2, 1  ;;  %vm283_vm5 = vcmp.eq.s32.totalorder %v155_v3, 1 }
  0x4a   :  { %v730_v11 = vsel %vm281_vm0, %v452_v51, 0.0  ;;  %v731_v12 = vsel %vm282_vm1, %v453_v56, 0.0  ;;  %v732_v13 = vsel %vm283_vm5, %v454_v57, 0.0  ;;  %vm1458_vm7 = vcmp.eq.s32.totalorder %v156_v6, 1 }
  0x4b   :  { %v977_v14 = vrot.slane %v730_v11, 6  ;;  %v978_v15 = vrot.slane %v731_v12, 4  ;;  %v979_v16 = vrot.slane %v732_v13, 2  ;;  %v729_v18 = vsel %vm1454_vm15, %v451_v50, 0.0  ;;  %v87_v12 = vld [vmem:[#allocation5 + $0x78] sm:$0xff] }
  0x4c   :  { %vm285_vm8 = vcmp.eq.s32.totalorder %v157_v7, 1  ;;  %vm286_vm9 = vcmp.eq.s32.totalorder %v158_v8, 1  ;;  %vm1464_vm10 = vcmp.eq.s32.totalorder %v159_v9, 1  ;;  %v733_v24 = vsel %vm1458_vm7, %v455_v60, 0.0  ;;  %v86_v8 = vld [vmem:[#allocation5 + $0x70] sm:$0xff] }
  0x4d   :  { %v1076_v20 = vsel %vm1049_vm2, %v729_v18, %v977_v14  ;;  %v1077_v21 = vsel %vm1051_vm3, %v978_v15, %v979_v16  ;;  %v734_v22 = vsel %vm285_vm8, %v456_v61, 0.0  ;;  %v735_v23 = vsel %vm286_vm9, %v457_v62, 0.0 }
  0x4e   :  { %v736_v25 = vsel %vm1464_vm10, %v458_v63, 0.0  ;;  %v980_v26 = vrot.slane %v734_v22, 6  ;;  %v981_v27 = vrot.slane %v735_v23, 4  ;;  %v1078_v33 = vsel %vm1053_vm4, %v1076_v20, %v1077_v21 }
  0x4f   :  { %v461_v28 = vld.sshfl [vmem:[#allocation1] sm:$0xff pattern:$0x73625140]  ;;  %v462_v29 = vld.sshfl [vmem:[#allocation1 + $0x8] sm:$0xff pattern:$0x73625140] }
  0x50   :  { %v463_v31 = vld.sshfl [vmem:[#allocation1 + $0x10] sm:$0xff pattern:$0x73625140]  ;;  %v464_v32 = vld.sshfl [vmem:[#allocation1 + $0x18] sm:$0xff pattern:$0x73625140]  ;;  %v1079_v40 = vsel %vm1049_vm2, %v733_v24, %v980_v26 }
  0x51   :  { %v1475_v35 = vld.sshfl [vmem:[#allocation1 + $0x20] sm:$0xff pattern:$0x73625140]  ;;  %v466_v36 = vld.sshfl [vmem:[#allocation1 + $0x28] sm:$0xff pattern:$0x73625140] }
  0x52   :  { %v467_v37 = vld.sshfl [vmem:[#allocation1 + $0x30] sm:$0xff pattern:$0x73625140]  ;;  %v468_v38 = vld.sshfl [vmem:[#allocation1 + $0x38] sm:$0xff pattern:$0x73625140] }
  0x53   :  { %1188 = vst [vmem:[#allocation7 + $0x40] sm:$0xff] %v1078_v33  ;;  %v982_v39 = vrot.slane %v736_v25, 2  ;;  %v109_v41 = vsel %vm61_vm14, 1, %v1314_v4  ;;  %v1482_v42 = vsel %vm62_vm6, 1, %v1314_v4 }
  0x54   :  { %469 = vst [vmem:[#allocation1] ss:$4 sm:$0xff] %v84_v30  ;;  %v160_v43 = vperm.slane %v109_v41, 0  ;;  %v161_v44 = vperm.slane %v109_v41, 1  ;;  %v162_v45 = vperm.slane %v109_v41, 2  ;;  %v163_v46 = vperm.slane %v109_v41, 3 }
  0x55   :  { %v1080_v47 = vsel %vm1051_vm3, %v981_v27, %v982_v39  ;;  %470 = vst [vmem:[#allocation1 + $0x20] ss:$4 sm:$0xff] %v85_v34  ;;  %v164_v48 = vperm.slane %v109_v41, 4  ;;  %v165_v49 = vperm.slane %v109_v41, 5  ;;  %v166_v50 = vperm.slane %v109_v41, 6  ;;  %v47_v34 = vld [vmem:[#allocation2 + $0x38] sm:$0xff] }
  0x56   :  { %v1081_v51 = vsel %vm1053_vm4, %v1079_v40, %v1080_v47  ;;  %vm1486_vm11 = vcmp.eq.s32.totalorder %v160_v43, 1  ;;  %vm289_vm12 = vcmp.eq.s32.totalorder %v161_v44, 1  ;;  %vm290_vm13 = vcmp.eq.s32.totalorder %v162_v45, 1 }
  0x57   :  { %1189 = vst [vmem:[#allocation7 + $0x48] sm:$0xff] %v1081_v51  ;;  %vm291_vm14 = vcmp.eq.s32.totalorder %v163_v46, 1  ;;  %v737_v53 = vsel %vm1486_vm11, %v461_v28, 0.0  ;;  %v738_v54 = vsel %vm289_vm12, %v462_v29, 0.0  ;;  %v739_v55 = vsel %vm290_vm13, %v463_v31, 0.0 }
  0x58   :  { %v740_v56 = vsel %vm291_vm14, %v464_v32, 0.0  ;;  %v983_v57 = vrot.slane %v738_v54, 6  ;;  %v984_v58 = vrot.slane %v739_v55, 4  ;;  %v167_v59 = vperm.slane %v109_v41, 7 }
  0x59   :  { %v985_v60 = vrot.slane %v740_v56, 2  ;;  %vm1492_vm15 = vcmp.eq.s32.totalorder %v164_v48, 1  ;;  %vm1496_vm0 = vcmp.eq.s32.totalorder %v165_v49, 1  ;;  %vm1500_vm1 = vcmp.eq.s32.totalorder %v166_v50, 1 }
  0x5a   :  { %v1082_v0 = vsel %vm1049_vm2, %v737_v53, %v983_v57  ;;  %vm1505_vm5 = vcmp.eq.s32.totalorder %v167_v59, 1  ;;  %v741_v2 = vsel %vm1492_vm15, %v1475_v35, 0.0  ;;  %v742_v3 = vsel %vm1496_vm0, %v466_v36, 0.0  ;;  %v89_v53 = vld [vmem:[#allocation5 + $0x88] sm:$0xff] }
  0x5b   :  { %v471_v5 = vld.sshfl [vmem:[#allocation1] sm:$0xff pattern:$0x73625140]  ;;  %v472_v6 = vld.sshfl [vmem:[#allocation1 + $0x8] sm:$0xff pattern:$0x73625140]  ;;  %v1083_v7 = vsel %vm1051_vm3, %v984_v58, %v985_v60 }
  0x5c   :  { %v473_v9 = vld.sshfl [vmem:[#allocation1 + $0x10] sm:$0xff pattern:$0x73625140]  ;;  %v474_v10 = vld.sshfl [vmem:[#allocation1 + $0x18] sm:$0xff pattern:$0x73625140]  ;;  %v1084_v11 = vsel %vm1053_vm4, %v1082_v0, %v1083_v7 }
  0x5d   :  { %v1516_v13 = vld.sshfl [vmem:[#allocation1 + $0x20] sm:$0xff pattern:$0x73625140]  ;;  %v476_v14 = vld.sshfl [vmem:[#allocation1 + $0x28] sm:$0xff pattern:$0x73625140] }
  0x5e   :  { %v477_v15 = vld.sshfl [vmem:[#allocation1 + $0x30] sm:$0xff pattern:$0x73625140]  ;;  %v478_v16 = vld.sshfl [vmem:[#allocation1 + $0x38] sm:$0xff pattern:$0x73625140] }
  0x5f   :  { %1190 = vst [vmem:[#allocation7 + $0x50] sm:$0xff] %v1084_v11  ;;  %v743_v17 = vsel %vm1500_vm1, %v467_v37, 0.0  ;;  %v744_v18 = vsel %vm1505_vm5, %v468_v38, 0.0  ;;  %v986_v19 = vrot.slane %v742_v3, 6  ;;  %v168_v20 = vperm.slane %v1482_v42, 0 }
  0x60   :  { %v987_v21 = vrot.slane %v743_v17, 4  ;;  %v988_v22 = vrot.slane %v744_v18, 2  ;;  %479 = vst [vmem:[#allocation1] ss:$4 sm:$0xff] %v86_v8  ;;  %v169_v23 = vperm.slane %v1482_v42, 1  ;;  %v170_v24 = vperm.slane %v1482_v42, 2 }
  0x61   :  { %v1085_v25 = vsel %vm1049_vm2, %v741_v2, %v986_v19  ;;  %480 = vst [vmem:[#allocation1 + $0x20] ss:$4 sm:$0xff] %v87_v12  ;;  %v171_v26 = vperm.slane %v1482_v42, 3  ;;  %vm1527_vm6 = vcmp.eq.s32.totalorder %v168_v20, 1  ;;  %v172_v28 = vperm.slane %v1482_v42, 4 }
  0x62   :  { %v1086_v29 = vsel %vm1051_vm3, %v987_v21, %v988_v22  ;;  %vm297_vm7 = vcmp.eq.s32.totalorder %v169_v23, 1  ;;  %vm298_vm8 = vcmp.eq.s32.totalorder %v170_v24, 1  ;;  %v745_v30 = vsel %vm1527_vm6, %v471_v5, 0.0 }
  0x63   :  { %v1087_v31 = vsel %vm1053_vm4, %v1085_v25, %v1086_v29  ;;  %vm299_vm9 = vcmp.eq.s32.totalorder %v171_v26, 1  ;;  %v746_v32 = vsel %vm297_vm7, %v472_v6, 0.0  ;;  %v747_v33 = vsel %vm298_vm8, %v473_v9, 0.0  ;;  %v90_v25 = vld [vmem:[#allocation5 + $0x90] sm:$0xff]  ;;  %v48_v26 = vld [vmem:[#allocation2 + $0x40] sm:$0xff] }
  0x64   :  { %1191 = vst [vmem:[#allocation7 + $0x58] sm:$0xff] %v1087_v31  ;;  %v748_v35 = vsel %vm299_vm9, %v474_v10, 0.0  ;;  %v989_v36 = vrot.slane %v746_v32, 6  ;;  %v990_v37 = vrot.slane %v747_v33, 4  ;;  %v173_v38 = vperm.slane %v1482_v42, 5 }
  0x65   :  { %v991_v39 = vrot.slane %v748_v35, 2  ;;  %v174_v40 = vperm.slane %v1482_v42, 6  ;;  %v175_v41 = vperm.slane %v1482_v42, 7  ;;  %vm1539_vm10 = vcmp.eq.s32.totalorder %v172_v28, 1  ;;  %v88_v42 = vld [vmem:[#allocation5 + $0x80] sm:$0xff] }
  0x66   :  { %v1088_v44 = vsel %vm1049_vm2, %v745_v30, %v989_v36  ;;  %vm1544_vm11 = vcmp.eq.s32.totalorder %v173_v38, 1  ;;  %v749_v46 = vsel %vm1539_vm10, %v1516_v13, 0.0  ;;  %vm63_vm12 = vcmp.ne.f32.partialorder %v47_v34, 0.0  ;;  %v91_v30 = vld [vmem:[#allocation5 + $0x98] sm:$0xff] }
  0x67   :  { %v481_v47 = vld.sshfl [vmem:[#allocation1] sm:$0xff pattern:$0x73625140]  ;;  %v482_v48 = vld.sshfl [vmem:[#allocation1 + $0x8] sm:$0xff pattern:$0x73625140]  ;;  %v1089_v49 = vsel %vm1051_vm3, %v990_v37, %v991_v39 }
  0x68   :  { %v483_v50 = vld.sshfl [vmem:[#allocation1 + $0x10] sm:$0xff pattern:$0x73625140]  ;;  %v484_v51 = vld.sshfl [vmem:[#allocation1 + $0x18] sm:$0xff pattern:$0x73625140]  ;;  %v1090_v52 = vsel %vm1053_vm4, %v1088_v44, %v1089_v49 }
  0x69   :  { %v1553_v54 = vld.sshfl [vmem:[#allocation1 + $0x20] sm:$0xff pattern:$0x73625140]  ;;  %v1555_v55 = vld.sshfl [vmem:[#allocation1 + $0x28] sm:$0xff pattern:$0x73625140] }
  0x6a   :  { %v1557_v56 = vld.sshfl [vmem:[#allocation1 + $0x30] sm:$0xff pattern:$0x73625140]  ;;  %v1559_v57 = vld.sshfl [vmem:[#allocation1 + $0x38] sm:$0xff pattern:$0x73625140] }
  0x6b   :  { %1192 = vst [vmem:[#allocation7 + $0x60] sm:$0xff] %v1090_v52  ;;  %vm302_vm13 = vcmp.eq.s32.totalorder %v174_v40, 1  ;;  %vm303_vm14 = vcmp.eq.s32.totalorder %v175_v41, 1  ;;  %v750_v58 = vsel %vm1544_vm11, %v476_v14, 0.0  ;;  %v111_v59 = vsel %vm63_vm12, 1, %v1314_v4 }
  0x6c   :  { %v751_v60 = vsel %vm302_vm13, %v477_v15, 0.0  ;;  %v752_v61 = vsel %vm303_vm14, %v478_v16, 0.0  ;;  %v992_v62 = vrot.slane %v750_v58, 6  ;;  %489 = vst [vmem:[#allocation1] ss:$4 sm:$0xff] %v88_v42  ;;  %v176_v63 = vperm.slane %v111_v59, 0 }
  0x6d   :  { %v993_v0 = vrot.slane %v751_v60, 4  ;;  %v994_v1 = vrot.slane %v752_v61, 2  ;;  %490 = vst [vmem:[#allocation1 + $0x20] ss:$4 sm:$0xff] %v89_v53  ;;  %v177_v2 = vperm.slane %v111_v59, 1  ;;  %v178_v3 = vperm.slane %v111_v59, 2 }
  0x6e   :  { %v1091_v5 = vsel %vm1049_vm2, %v749_v46, %v992_v62  ;;  %v179_v6 = vperm.slane %v111_v59, 3  ;;  %vm1566_vm15 = vcmp.eq.s32.totalorder %v176_v63, 1  ;;  %v180_v8 = vperm.slane %v111_v59, 4  ;;  %v92_v62 = vld [vmem:[#allocation5 + $0xa0] sm:$0xff] }
  0x6f   :  { %v1092_v9 = vsel %vm1051_vm3, %v993_v0, %v994_v1  ;;  %vm305_vm0 = vcmp.eq.s32.totalorder %v177_v2, 1  ;;  %vm306_vm1 = vcmp.eq.s32.totalorder %v178_v3, 1  ;;  %v753_v10 = vsel %vm1566_vm15, %v481_v47, 0.0  ;;  %v93_v1 = vld [vmem:[#allocation5 + $0xa8] sm:$0xff] }
  0x70   :  { %v1093_v11 = vsel %vm1053_vm4, %v1091_v5, %v1092_v9  ;;  %vm307_vm5 = vcmp.eq.s32.totalorder %v179_v6, 1  ;;  %v754_v12 = vsel %vm305_vm0, %v482_v48, 0.0  ;;  %v755_v13 = vsel %vm306_vm1, %v483_v50, 0.0  ;;  %v49_v2 = vld [vmem:[#allocation2 + $0x48] sm:$0xff] }
  0x71   :  { %1193 = vst [vmem:[#allocation7 + $0x68] sm:$0xff] %v1093_v11  ;;  %v756_v14 = vsel %vm307_vm5, %v484_v51, 0.0  ;;  %v995_v15 = vrot.slane %v754_v12, 6  ;;  %v996_v16 = vrot.slane %v755_v13, 4  ;;  %v181_v17 = vperm.slane %v111_v59, 5 }
  0x72   :  { %v997_v18 = vrot.slane %v756_v14, 2  ;;  %v182_v19 = vperm.slane %v111_v59, 6  ;;  %v183_v20 = vperm.slane %v111_v59, 7  ;;  %vm1574_vm6 = vcmp.eq.s32.totalorder %v180_v8, 1 }
  0x73   :  { %v1578_v22 = vld.sshfl [vmem:[#allocation1] sm:$0xff pattern:$0x73625140]  ;;  %v492_v23 = vld.sshfl [vmem:[#allocation1 + $0x8] sm:$0xff pattern:$0x73625140]  ;;  %v1094_v24 = vsel %vm1049_vm2, %v753_v10, %v995_v15 }
  0x74   :  { %v493_v27 = vld.sshfl [vmem:[#allocation1 + $0x10] sm:$0xff pattern:$0x73625140]  ;;  %v494_v28 = vld.sshfl [vmem:[#allocation1 + $0x18] sm:$0xff pattern:$0x73625140]  ;;  %v1095_v29 = vsel %vm1051_vm3, %v996_v16, %v997_v18 }
  0x75   :  { %v1582_v31 = vld.sshfl [vmem:[#allocation1 + $0x20] sm:$0xff pattern:$0x73625140]  ;;  %v1584_v32 = vld.sshfl [vmem:[#allocation1 + $0x28] sm:$0xff pattern:$0x73625140]  ;;  %v1096_v33 = vsel %vm1053_vm4, %v1094_v24, %v1095_v29 }
  0x76   :  { %v1587_v34 = vld.sshfl [vmem:[#allocation1 + $0x30] sm:$0xff pattern:$0x73625140]  ;;  %v1589_v35 = vld.sshfl [vmem:[#allocation1 + $0x38] sm:$0xff pattern:$0x73625140] }
  0x77   :  { %1194 = vst [vmem:[#allocation7 + $0x70] sm:$0xff] %v1096_v33  ;;  %vm309_vm7 = vcmp.eq.s32.totalorder %v181_v17, 1  ;;  %vm310_vm8 = vcmp.eq.s32.totalorder %v182_v19, 1  ;;  %vm311_vm9 = vcmp.eq.s32.totalorder %v183_v20, 1  ;;  %v757_v36 = vsel %vm1574_vm6, %v1553_v54, 0.0 }
  0x78   :  { %v758_v37 = vsel %vm309_vm7, %v1555_v55, 0.0  ;;  %v759_v38 = vsel %vm310_vm8, %v1557_v56, 0.0  ;;  %v760_v39 = vsel %vm311_vm9, %v1559_v57, 0.0  ;;  %499 = vst [vmem:[#allocation1] ss:$4 sm:$0xff] %v90_v25  ;;  %vm64_vm10 = vcmp.ne.f32.partialorder %v48_v26, 0.0 }
  0x79   :  { %v998_v40 = vrot.slane %v758_v37, 6  ;;  %v999_v41 = vrot.slane %v759_v38, 4  ;;  %v1000_v43 = vrot.slane %v760_v39, 2  ;;  %500 = vst [vmem:[#allocation1 + $0x20] ss:$4 sm:$0xff] %v91_v30  ;;  %v112_v44 = vsel %vm64_vm10, 1, %v1314_v4 }
  0x7a   :  { %v184_v45 = vperm.slane %v112_v44, 0  ;;  %v185_v46 = vperm.slane %v112_v44, 1  ;;  %v186_v47 = vperm.slane %v112_v44, 2  ;;  %v187_v48 = vperm.slane %v112_v44, 3  ;;  %v94_v38 = vld [vmem:[#allocation5 + $0xb0] sm:$0xff] }
  0x7b   :  { %v1097_v49 = vsel %vm1049_vm2, %v757_v36, %v998_v40  ;;  %v1098_v42 = vsel %vm1051_vm3, %v999_v41, %v1000_v43  ;;  %v188_v50 = vperm.slane %v112_v44, 4  ;;  %v189_v51 = vperm.slane %v112_v44, 5  ;;  %v95_v41 = vld [vmem:[#allocation5 + $0xb8] sm:$0xff] }
  0x7c   :  { %v1099_v52 = vsel %vm1053_vm4, %v1097_v49, %v1098_v42  ;;  %vm1601_vm11 = vcmp.eq.s32.totalorder %v184_v45, 1  ;;  %vm313_vm12 = vcmp.eq.s32.totalorder %v185_v46, 1  ;;  %vm314_vm13 = vcmp.eq.s32.totalorder %v186_v47, 1 }
  0x7d   :  { %1195 = vst [vmem:[#allocation7 + $0x78] sm:$0xff] %v1099_v52  ;;  %vm1605_vm14 = vcmp.eq.s32.totalorder %v187_v48, 1  ;;  %v761_v55 = vsel %vm1601_vm11, %v1578_v22, 0.0  ;;  %v762_v56 = vsel %vm313_vm12, %v492_v23, 0.0  ;;  %v763_v57 = vsel %vm314_vm13, %v493_v27, 0.0 }
  0x7e   :  { %v764_v58 = vsel %vm1605_vm14, %v494_v28, 0.0  ;;  %v1001_v59 = vrot.slane %v762_v56, 6  ;;  %v1002_v60 = vrot.slane %v763_v57, 4  ;;  %v190_v61 = vperm.slane %v112_v44, 6  ;;  %v98_v56 = vld [vmem:[#allocation5 + $0xd0] sm:$0xff] }
  0x7f   :  { %v1614_v63 = vld.sshfl [vmem:[#allocation1] sm:$0xff pattern:$0x73625140]  ;;  %v502_v0 = vld.sshfl [vmem:[#allocation1 + $0x8] sm:$0xff pattern:$0x73625140] }
  0x80   :  { %v503_v3 = vld.sshfl [vmem:[#allocation1 + $0x10] sm:$0xff pattern:$0x73625140]  ;;  %v504_v5 = vld.sshfl [vmem:[#allocation1 + $0x18] sm:$0xff pattern:$0x73625140]  ;;  %v1100_v10 = vsel %vm1049_vm2, %v761_v55, %v1001_v59 }
  0x81   :  { %v1616_v6 = vld.sshfl [vmem:[#allocation1 + $0x20] sm:$0xff pattern:$0x73625140]  ;;  %v1618_v7 = vld.sshfl [vmem:[#allocation1 + $0x28] sm:$0xff pattern:$0x73625140] }
  0x82   :  { %v1620_v8 = vld.sshfl [vmem:[#allocation1 + $0x30] sm:$0xff pattern:$0x73625140]  ;;  %v1622_v9 = vld.sshfl [vmem:[#allocation1 + $0x38] sm:$0xff pattern:$0x73625140] }
  0x83   :  { %v1003_v11 = vrot.slane %v764_v58, 2  ;;  %v191_v12 = vperm.slane %v112_v44, 7  ;;  %vm1625_vm15 = vcmp.eq.s32.totalorder %v188_v50, 1  ;;  %vm317_vm0 = vcmp.eq.s32.totalorder %v189_v51, 1  ;;  %509 = vst [vmem:[#allocation1] ss:$4 sm:$0xff] %v92_v62 }
  0x84   :  { %vm318_vm1 = vcmp.eq.s32.totalorder %v190_v61, 1  ;;  %v765_v14 = vsel %vm1625_vm15, %v1582_v31, 0.0  ;;  %v766_v15 = vsel %vm317_vm0, %v1584_v32, 0.0  ;;  %510 = vst [vmem:[#allocation1 + $0x20] ss:$4 sm:$0xff] %v93_v1  ;;  %vm65_vm5 = vcmp.ne.f32.partialorder %v49_v2, 0.0 }
  0x85   :  { %v1101_v16 = vsel %vm1051_vm3, %v1002_v60, %v1003_v11  ;;  %vm319_vm6 = vcmp.eq.s32.totalorder %v191_v12, 1  ;;  %v767_v17 = vsel %vm318_vm1, %v1587_v34, 0.0  ;;  %v1004_v18 = vrot.slane %v766_v15, 6  ;;  %v50_v50 = vld [vmem:[#allocation2 + $0x50] sm:$0xff]  ;;  %v51_v60 = vld [vmem:[#allocation2 + $0x58] sm:$0xff] }
  0x86   :  { %v1102_v19 = vsel %vm1053_vm4, %v1100_v10, %v1101_v16  ;;  %v768_v20 = vsel %vm319_vm6, %v1589_v35, 0.0  ;;  %v1005_v21 = vrot.slane %v767_v17, 4  ;;  %v113_v22 = vsel %vm65_vm5, 1, %v1314_v4 }
  0x87   :  { %1196 = vst [vmem:[#allocation7 + $0x80] sm:$0xff] %v1102_v19  ;;  %v1006_v23 = vrot.slane %v768_v20, 2  ;;  %v1103_v24 = vsel %vm1049_vm2, %v765_v14, %v1004_v18  ;;  %v192_v25 = vperm.slane %v113_v22, 0  ;;  %v193_v26 = vperm.slane %v113_v22, 1  ;;  %v96_v14 = vld [vmem:[#allocation5 + $0xc0] sm:$0xff]  ;;  %v97_v18 = vld [vmem:[#allocation5 + $0xc8] sm:$0xff] }
  0x88   :  { %v194_v27 = vperm.slane %v113_v22, 2  ;;  %v195_v28 = vperm.slane %v113_v22, 3  ;;  %v196_v29 = vperm.slane %v113_v22, 4  ;;  %v197_v30 = vperm.slane %v113_v22, 5 }
  0x89   :  { %v1104_v31 = vsel %vm1051_vm3, %v1005_v21, %v1006_v23  ;;  %vm1640_vm7 = vcmp.eq.s32.totalorder %v192_v25, 1  ;;  %vm1644_vm8 = vcmp.eq.s32.totalorder %v193_v26, 1  ;;  %v198_v34 = vperm.slane %v113_v22, 6 }
  0x8a   :  { %v1105_v35 = vsel %vm1053_vm4, %v1103_v24, %v1104_v31  ;;  %v1649_v36 = vld.sshfl [vmem:[#allocation1] sm:$0xff pattern:$0x73625140]  ;;  %v1651_v37 = vld.sshfl [vmem:[#allocation1 + $0x8] sm:$0xff pattern:$0x73625140] }
  0x8b   :  { %1197 = vst [vmem:[#allocation7 + $0x88] sm:$0xff] %v1105_v35  ;;  %v1653_v39 = vld.sshfl [vmem:[#allocation1 + $0x10] sm:$0xff pattern:$0x73625140]  ;;  %vm322_vm9 = vcmp.eq.s32.totalorder %v194_v27, 1  ;;  %vm1655_vm10 = vcmp.eq.s32.totalorder %v195_v28, 1 }
  0x8c   :  { %v1659_v43 = vld.sshfl [vmem:[#allocation1 + $0x18] sm:$0xff pattern:$0x73625140]  ;;  %v1661_v44 = vld.sshfl [vmem:[#allocation1 + $0x20] sm:$0xff pattern:$0x73625140] }
  0x8d   :  { %v1663_v45 = vld.sshfl [vmem:[#allocation1 + $0x28] sm:$0xff pattern:$0x73625140]  ;;  %v1665_v46 = vld.sshfl [vmem:[#allocation1 + $0x30] sm:$0xff pattern:$0x73625140] }
  0x8e   :  { %v1667_v47 = vld.sshfl [vmem:[#allocation1 + $0x38] sm:$0xff pattern:$0x73625140]  ;;  %v769_v48 = vsel %vm1640_vm7, %v1614_v63, 0.0  ;;  %v770_v49 = vsel %vm1644_vm8, %v502_v0, 0.0  ;;  %v771_v42 = vsel %vm322_vm9, %v503_v3, 0.0 }
  0x8f   :  { %v772_v51 = vsel %vm1655_vm10, %v504_v5, 0.0  ;;  %v1007_v52 = vrot.slane %v770_v49, 6  ;;  %v1008_v53 = vrot.slane %v771_v42, 4  ;;  %v199_v54 = vperm.slane %v113_v22, 7  ;;  %519 = vst [vmem:[#allocation1] ss:$4 sm:$0xff] %v94_v38 }
  0x90   :  { %v1009_v55 = vrot.slane %v772_v51, 2  ;;  %vm1676_vm11 = vcmp.eq.s32.totalorder %v196_v29, 1  ;;  %vm325_vm12 = vcmp.eq.s32.totalorder %v197_v30, 1  ;;  %vm326_vm13 = vcmp.eq.s32.totalorder %v198_v34, 1  ;;  %520 = vst [vmem:[#allocation1 + $0x20] ss:$4 sm:$0xff] %v95_v41 }
  0x91   :  { %v1106_v57 = vsel %vm1049_vm2, %v769_v48, %v1007_v52  ;;  %vm327_vm14 = vcmp.eq.s32.totalorder %v199_v54, 1  ;;  %v773_v58 = vsel %vm1676_vm11, %v1616_v6, 0.0  ;;  %v774_v59 = vsel %vm325_vm12, %v1618_v7, 0.0  ;;  %v1713_v24 = vld [vmem:[#allocation2 + $0x60] sm:$0xff] }
  0x92   :  { %v1107_v61 = vsel %vm1051_vm3, %v1008_v53, %v1009_v55  ;;  %v775_v62 = vsel %vm326_vm13, %v1620_v8, 0.0  ;;  %v776_v63 = vsel %vm327_vm14, %v1622_v9, 0.0  ;;  %v1010_v0 = vrot.slane %v774_v59, 6 }
  0x93   :  { %v1108_v1 = vsel %vm1053_vm4, %v1106_v57, %v1107_v61  ;;  %v1011_v2 = vrot.slane %v775_v62, 4  ;;  %v1012_v3 = vrot.slane %v776_v63, 2  ;;  %vm66_vm15 = vcmp.ne.f32.partialorder %v50_v50, 0.0 }
  0x94   :  { %1198 = vst [vmem:[#allocation7 + $0x90] sm:$0xff] %v1108_v1  ;;  %v1109_v5 = vsel %vm1049_vm2, %v773_v58, %v1010_v0  ;;  %v114_v6 = vsel %vm66_vm15, 1, %v1314_v4  ;;  %vm67_vm0 = vcmp.ne.f32.partialorder %v51_v60, 0.0  ;;  %vm68_vm12 = vcmp.ne.f32.partialorder %v1713_v24, 0.0 }
  0x95   :  { %v1110_v7 = vsel %vm1051_vm3, %v1011_v2, %v1012_v3  ;;  %v200_v10 = vperm.slane %v114_v6, 0  ;;  %v201_v11 = vperm.slane %v114_v6, 1  ;;  %v202_v12 = vperm.slane %v114_v6, 2 }
  0x96   :  { %v1111_v8 = vsel %vm1053_vm4, %v1109_v5, %v1110_v7  ;;  %v1693_v9 = vld.sshfl [vmem:[#allocation1] sm:$0xff pattern:$0x73625140]  ;;  %v1695_v13 = vld.sshfl [vmem:[#allocation1 + $0x8] sm:$0xff pattern:$0x73625140] }
  0x97   :  { %1199 = vst [vmem:[#allocation7 + $0x98] sm:$0xff] %v1111_v8  ;;  %v1697_v15 = vld.sshfl [vmem:[#allocation1 + $0x10] sm:$0xff pattern:$0x73625140]  ;;  %v203_v16 = vperm.slane %v114_v6, 3  ;;  %vm1699_vm1 = vcmp.eq.s32.totalorder %v200_v10, 1 }
  0x98   :  { %v1703_v19 = vld.sshfl [vmem:[#allocation1 + $0x18] sm:$0xff pattern:$0x73625140]  ;;  %v1705_v20 = vld.sshfl [vmem:[#allocation1 + $0x20] sm:$0xff pattern:$0x73625140] }
  0x99   :  { %v1707_v21 = vld.sshfl [vmem:[#allocation1 + $0x28] sm:$0xff pattern:$0x73625140]  ;;  %v1709_v22 = vld.sshfl [vmem:[#allocation1 + $0x30] sm:$0xff pattern:$0x73625140] }
  0x9a   :  { %v1711_v23 = vld.sshfl [vmem:[#allocation1 + $0x38] sm:$0xff pattern:$0x73625140]  ;;  %vm329_vm5 = vcmp.eq.s32.totalorder %v201_v11, 1  ;;  %vm330_vm6 = vcmp.eq.s32.totalorder %v202_v12, 1  ;;  %vm331_vm7 = vcmp.eq.s32.totalorder %v203_v16, 1 }
  0x9b   :  { %v777_v25 = vsel %vm1699_vm1, %v1649_v36, 0.0  ;;  %v778_v26 = vsel %vm329_vm5, %v1651_v37, 0.0  ;;  %v779_v27 = vsel %vm330_vm6, %v1653_v39, 0.0  ;;  %v780_v28 = vsel %vm331_vm7, %v1659_v43, 0.0  ;;  %529 = vst [vmem:[#allocation1] ss:$4 sm:$0xff] %v96_v14 }
  0x9c   :  { %v1013_v29 = vrot.slane %v778_v26, 6  ;;  %v1014_v30 = vrot.slane %v779_v27, 4  ;;  %v1015_v31 = vrot.slane %v780_v28, 2  ;;  %v204_v32 = vperm.slane %v114_v6, 4  ;;  %530 = vst [vmem:[#allocation1 + $0x20] ss:$4 sm:$0xff] %v97_v18 }
  0x9d   :  { %v205_v33 = vperm.slane %v114_v6, 5  ;;  %v206_v34 = vperm.slane %v114_v6, 6  ;;  %v207_v35 = vperm.slane %v114_v6, 7  ;;  %v115_v38 = vsel %vm67_vm0, 1, %v1314_v4 }
  0x9e   :  { %v1112_v36 = vsel %vm1049_vm2, %v777_v25, %v1013_v29  ;;  %v1113_v37 = vsel %vm1051_vm3, %v1014_v30, %v1015_v31  ;;  %vm1725_vm8 = vcmp.eq.s32.totalorder %v204_v32, 1  ;;  %v208_v40 = vperm.slane %v115_v38, 0 }
  0x9f   :  { %v1114_v41 = vsel %vm1053_vm4, %v1112_v36, %v1113_v37  ;;  %vm333_vm9 = vcmp.eq.s32.totalorder %v205_v33, 1  ;;  %vm334_vm10 = vcmp.eq.s32.totalorder %v206_v34, 1  ;;  %vm335_vm11 = vcmp.eq.s32.totalorder %v207_v35, 1  ;;  %v100_v33 = vld [vmem:[#allocation5 + $0xe0] sm:$0xff] }
  0xa0   :  { %1200 = vst [vmem:[#allocation7 + $0xa0] sm:$0xff] %v1114_v41  ;;  %v781_v43 = vsel %vm1725_vm8, %v1661_v44, 0.0  ;;  %v782_v48 = vsel %vm333_vm9, %v1663_v45, 0.0  ;;  %v783_v49 = vsel %vm334_vm10, %v1665_v46, 0.0  ;;  %v784_v42 = vsel %vm335_vm11, %v1667_v47, 0.0  ;;  %v99_v46 = vld [vmem:[#allocation5 + $0xd8] sm:$0xff] }
  0xa1   :  { %v1016_v50 = vrot.slane %v782_v48, 6  ;;  %v1017_v51 = vrot.slane %v783_v49, 4  ;;  %v1018_v52 = vrot.slane %v784_v42, 2  ;;  %v209_v53 = vperm.slane %v115_v38, 1 }
  0xa2   :  { %v1737_v54 = vld.sshfl [vmem:[#allocation1] sm:$0xff pattern:$0x73625140]  ;;  %v1739_v55 = vld.sshfl [vmem:[#allocation1 + $0x8] sm:$0xff pattern:$0x73625140] }
  0xa3   :  { %v1115_v57 = vsel %vm1049_vm2, %v781_v43, %v1016_v50  ;;  %v1116_v58 = vsel %vm1051_vm3, %v1017_v51, %v1018_v52  ;;  %v1743_v44 = vld.sshfl [vmem:[#allocation1 + $0x10] sm:$0xff pattern:$0x73625140]  ;;  %v1745_v45 = vld.sshfl [vmem:[#allocation1 + $0x18] sm:$0xff pattern:$0x73625140] }
  0xa4   :  { %v1117_v47 = vsel %vm1053_vm4, %v1115_v57, %v1116_v58  ;;  %v1748_v59 = vld.sshfl [vmem:[#allocation1 + $0x20] sm:$0xff pattern:$0x73625140]  ;;  %v1750_v60 = vld.sshfl [vmem:[#allocation1 + $0x28] sm:$0xff pattern:$0x73625140] }
  0xa5   :  { %1201 = vst [vmem:[#allocation7 + $0xa8] sm:$0xff] %v1117_v47  ;;  %v1752_v61 = vld.sshfl [vmem:[#allocation1 + $0x30] sm:$0xff pattern:$0x73625140]  ;;  %v210_v62 = vperm.slane %v115_v38, 2  ;;  %v211_v63 = vperm.slane %v115_v38, 3 }
  0xa6   :  { %v1754_v0 = vld.sshfl [vmem:[#allocation1 + $0x38] sm:$0xff pattern:$0x73625140]  ;;  %vm1756_vm13 = vcmp.eq.s32.totalorder %v208_v40, 1  ;;  %vm337_vm14 = vcmp.eq.s32.totalorder %v209_v53, 1  ;;  %v212_v2 = vperm.slane %v115_v38, 4 }
  0xa7   :  { %vm338_vm15 = vcmp.eq.s32.totalorder %v210_v62, 1  ;;  %vm339_vm0 = vcmp.eq.s32.totalorder %v211_v63, 1  ;;  %v785_v3 = vsel %vm1756_vm13, %v1693_v9, 0.0  ;;  %v786_v5 = vsel %vm337_vm14, %v1695_v13, 0.0  ;;  %539 = vst [vmem:[#allocation1] ss:$4 sm:$0xff] %v98_v56 }
  0xa8   :  { %v787_v6 = vsel %vm338_vm15, %v1697_v15, 0.0  ;;  %v788_v7 = vsel %vm339_vm0, %v1703_v19, 0.0  ;;  %v1019_v10 = vrot.slane %v786_v5, 6  ;;  %v213_v11 = vperm.slane %v115_v38, 5  ;;  %540 = vst [vmem:[#allocation1 + $0x20] ss:$4 sm:$0xff] %v99_v46 }
  0xa9   :  { %v1020_v12 = vrot.slane %v787_v6, 4  ;;  %v1021_v8 = vrot.slane %v788_v7, 2  ;;  %v214_v14 = vperm.slane %v115_v38, 6  ;;  %v215_v16 = vperm.slane %v115_v38, 7  ;;  %v54_v5 = vld [vmem:[#allocation2 + $0x70] sm:$0xff] }
  0xaa   :  { %v1118_v17 = vsel %vm1049_vm2, %v785_v3, %v1019_v10  ;;  %vm1767_vm1 = vcmp.eq.s32.totalorder %v212_v2, 1  ;;  %vm341_vm5 = vcmp.eq.s32.totalorder %v213_v11, 1  ;;  %v116_v9 = vsel %vm68_vm12, 1, %v1314_v4 }
  0xab   :  { %v1119_v13 = vsel %vm1051_vm3, %v1020_v12, %v1021_v8  ;;  %vm342_vm6 = vcmp.eq.s32.totalorder %v214_v14, 1  ;;  %vm343_vm7 = vcmp.eq.s32.totalorder %v215_v16, 1  ;;  %v789_v15 = vsel %vm1767_vm1, %v1705_v20, 0.0  ;;  %v103_v14 = vld [vmem:[#allocation5 + $0xf8] sm:$0xff] }
  0xac   :  { %v1120_v19 = vsel %vm1053_vm4, %v1118_v17, %v1119_v13  ;;  %v790_v25 = vsel %vm341_vm5, %v1707_v21, 0.0  ;;  %v791_v26 = vsel %vm342_vm6, %v1709_v22, 0.0  ;;  %v792_v27 = vsel %vm343_vm7, %v1711_v23, 0.0  ;;  %v101_v22 = vld [vmem:[#allocation5 + $0xe8] sm:$0xff] }
  0xad   :  { %1202 = vst [vmem:[#allocation7 + $0xb0] sm:$0xff] %v1120_v19  ;;  %v1022_v28 = vrot.slane %v790_v25, 6  ;;  %v1023_v24 = vrot.slane %v791_v26, 4  ;;  %v1024_v29 = vrot.slane %v792_v27, 2  ;;  %v216_v30 = vperm.slane %v116_v9, 0 }
  0xae   :  { %v1782_v31 = vld.sshfl [vmem:[#allocation1] sm:$0xff pattern:$0x73625140]  ;;  %v1784_v32 = vld.sshfl [vmem:[#allocation1 + $0x8] sm:$0xff pattern:$0x73625140] }
  0xaf   :  { %v1121_v20 = vsel %vm1049_vm2, %v789_v15, %v1022_v28  ;;  %v1122_v34 = vsel %vm1051_vm3, %v1023_v24, %v1024_v29  ;;  %v1788_v35 = vld.sshfl [vmem:[#allocation1 + $0x10] sm:$0xff pattern:$0x73625140]  ;;  %v1790_v21 = vld.sshfl [vmem:[#allocation1 + $0x18] sm:$0xff pattern:$0x73625140] }
  0xb0   :  { %v1123_v23 = vsel %vm1053_vm4, %v1121_v20, %v1122_v34  ;;  %v1793_v38 = vld.sshfl [vmem:[#allocation1 + $0x20] sm:$0xff pattern:$0x73625140]  ;;  %v1795_v36 = vld.sshfl [vmem:[#allocation1 + $0x28] sm:$0xff pattern:$0x73625140] }
  0xb1   :  { %1203 = vst [vmem:[#allocation7 + $0xb8] sm:$0xff] %v1123_v23  ;;  %v1797_v37 = vld.sshfl [vmem:[#allocation1 + $0x30] sm:$0xff pattern:$0x73625140]  ;;  %v217_v39 = vperm.slane %v116_v9, 1  ;;  %v218_v40 = vperm.slane %v116_v9, 2 }
  0xb2   :  { %v1799_v41 = vld.sshfl [vmem:[#allocation1 + $0x38] sm:$0xff pattern:$0x73625140]  ;;  %v219_v43 = vperm.slane %v116_v9, 3  ;;  %vm1801_vm8 = vcmp.eq.s32.totalorder %v216_v30, 1  ;;  %v220_v49 = vperm.slane %v116_v9, 4 }
  0xb3   :  { %vm345_vm9 = vcmp.eq.s32.totalorder %v217_v39, 1  ;;  %vm346_vm10 = vcmp.eq.s32.totalorder %v218_v40, 1  ;;  %v793_v42 = vsel %vm1801_vm8, %v1737_v54, 0.0  ;;  %v221_v50 = vperm.slane %v116_v9, 5  ;;  %549 = vst [vmem:[#allocation1] ss:$4 sm:$0xff] %v100_v33 }
  0xb4   :  { %vm347_vm11 = vcmp.eq.s32.totalorder %v219_v43, 1  ;;  %v794_v51 = vsel %vm345_vm9, %v1739_v55, 0.0  ;;  %v795_v52 = vsel %vm346_vm10, %v1743_v44, 0.0  ;;  %v222_v53 = vperm.slane %v116_v9, 6  ;;  %550 = vst [vmem:[#allocation1 + $0x20] ss:$4 sm:$0xff] %v101_v22 }
  0xb5   :  { %v796_v56 = vsel %vm347_vm11, %v1745_v45, 0.0  ;;  %v1025_v57 = vrot.slane %v794_v51, 6  ;;  %v1026_v58 = vrot.slane %v795_v52, 4  ;;  %v223_v46 = vperm.slane %v116_v9, 7  ;;  %v53_v54 = vld [vmem:[#allocation2 + $0x68] sm:$0xff] }
  0xb6   :  { %v1027_v47 = vrot.slane %v796_v56, 2  ;;  %vm1811_vm12 = vcmp.eq.s32.totalorder %v220_v49, 1  ;;  %vm349_vm13 = vcmp.eq.s32.totalorder %v221_v50, 1  ;;  %vm350_vm14 = vcmp.eq.s32.totalorder %v222_v53, 1 }
  0xb7   :  { %v1124_v63 = vsel %vm1049_vm2, %v793_v42, %v1025_v57  ;;  %vm351_vm15 = vcmp.eq.s32.totalorder %v223_v46, 1  ;;  %v797_v55 = vsel %vm1811_vm12, %v1748_v59, 0.0  ;;  %v798_v44 = vsel %vm349_vm13, %v1750_v60, 0.0  ;;  %v102_v60 = vld [vmem:[#allocation5 + $0xf0] sm:$0xff] }
  0xb8   :  { %v1125_v45 = vsel %vm1051_vm3, %v1026_v58, %v1027_v47  ;;  %v799_v1 = vsel %vm350_vm14, %v1752_v61, 0.0  ;;  %v800_v2 = vsel %vm351_vm15, %v1754_v0, 0.0  ;;  %v1028_v3 = vrot.slane %v798_v44, 6 }
  0xb9   :  { %v1126_v6 = vsel %vm1053_vm4, %v1124_v63, %v1125_v45  ;;  %v1029_v7 = vrot.slane %v799_v1, 4  ;;  %v1030_v10 = vrot.slane %v800_v2, 2  ;;  %vm69_vm0 = vcmp.ne.f32.partialorder %v53_v54, 0.0 }
  0xba   :  { %1204 = vst [vmem:[#allocation7 + $0xc0] sm:$0xff] %v1126_v6  ;;  %v1127_v11 = vsel %vm1049_vm2, %v797_v55, %v1028_v3  ;;  %v1825_v12 = vld.sshfl [vmem:[#allocation1] sm:$0xff pattern:$0x73625140]  ;;  %v117_v59 = vsel %vm69_vm0, 1, %v1314_v4  ;;  %vm70_vm1 = vcmp.ne.f32.partialorder %v54_v5, 0.0 }
  0xbb   :  { %v1128_v8 = vsel %vm1051_vm3, %v1029_v7, %v1030_v10  ;;  %v1829_v61 = vld.sshfl [vmem:[#allocation1 + $0x8] sm:$0xff pattern:$0x73625140]  ;;  %v1831_v0 = vld.sshfl [vmem:[#allocation1 + $0x10] sm:$0xff pattern:$0x73625140] }
  0xbc   :  { %v1129_v16 = vsel %vm1053_vm4, %v1127_v11, %v1128_v8  ;;  %v1834_v17 = vld.sshfl [vmem:[#allocation1 + $0x18] sm:$0xff pattern:$0x73625140]  ;;  %v1836_v18 = vld.sshfl [vmem:[#allocation1 + $0x20] sm:$0xff pattern:$0x73625140] }
  0xbd   :  { %1205 = vst [vmem:[#allocation7 + $0xc8] sm:$0xff] %v1129_v16  ;;  %v1838_v9 = vld.sshfl [vmem:[#allocation1 + $0x28] sm:$0xff pattern:$0x73625140]  ;;  %v224_v13 = vperm.slane %v117_v59, 0  ;;  %v225_v15 = vperm.slane %v117_v59, 1 }
  0xbe   :  { %v1840_v19 = vld.sshfl [vmem:[#allocation1 + $0x30] sm:$0xff pattern:$0x73625140]  ;;  %v1842_v25 = vld.sshfl [vmem:[#allocation1 + $0x38] sm:$0xff pattern:$0x73625140] }
  0xbf   :  { %v226_v26 = vperm.slane %v117_v59, 2  ;;  %v227_v27 = vperm.slane %v117_v59, 3  ;;  %vm1844_vm5 = vcmp.eq.s32.totalorder %v224_v13, 1  ;;  %vm353_vm6 = vcmp.eq.s32.totalorder %v225_v15, 1  ;;  %559 = vst [vmem:[#allocation1] ss:$4 sm:$0xff] %v102_v60 }
  0xc0   :  { %v801_v24 = vsel %vm1844_vm5, %v1782_v31, 0.0  ;;  %v802_v29 = vsel %vm353_vm6, %v1784_v32, 0.0  ;;  %v228_v30 = vperm.slane %v117_v59, 4  ;;  %v229_v33 = vperm.slane %v117_v59, 5  ;;  %560 = vst [vmem:[#allocation1 + $0x20] ss:$4 sm:$0xff] %v103_v14 }
  0xc1   :  { %vm354_vm7 = vcmp.eq.s32.totalorder %v226_v26, 1  ;;  %vm355_vm8 = vcmp.eq.s32.totalorder %v227_v27, 1  ;;  %v1031_v20 = vrot.slane %v802_v29, 6  ;;  %v230_v34 = vperm.slane %v117_v59, 6  ;;  %v55_v10 = vld [vmem:[#allocation2 + $0x78] sm:$0xff] }
  0xc2   :  { %v803_v22 = vsel %vm354_vm7, %v1788_v35, 0.0  ;;  %v804_v23 = vsel %vm355_vm8, %v1790_v21, 0.0  ;;  %v231_v39 = vperm.slane %v117_v59, 7  ;;  %vm1854_vm9 = vcmp.eq.s32.totalorder %v228_v30, 1 }
  0xc3   :  { %v1032_v43 = vrot.slane %v803_v22, 4  ;;  %v1033_v31 = vrot.slane %v804_v23, 2  ;;  %v1130_v32 = vsel %vm1049_vm2, %v801_v24, %v1031_v20  ;;  %vm357_vm10 = vcmp.eq.s32.totalorder %v229_v33, 1 }
  0xc4   :  { %vm358_vm11 = vcmp.eq.s32.totalorder %v230_v34, 1  ;;  %vm359_vm12 = vcmp.eq.s32.totalorder %v231_v39, 1  ;;  %v805_v48 = vsel %vm1854_vm9, %v1793_v38, 0.0  ;;  %v806_v35 = vsel %vm357_vm10, %v1795_v36, 0.0 }
  0xc5   :  { %v1131_v21 = vsel %vm1051_vm3, %v1032_v43, %v1033_v31  ;;  %v807_v49 = vsel %vm358_vm11, %v1797_v37, 0.0  ;;  %v808_v42 = vsel %vm359_vm12, %v1799_v41, 0.0  ;;  %v1034_v50 = vrot.slane %v806_v35, 6 }
  0xc6   :  { %v1132_v51 = vsel %vm1053_vm4, %v1130_v32, %v1131_v21  ;;  %v1035_v52 = vrot.slane %v807_v49, 4  ;;  %v1036_v53 = vrot.slane %v808_v42, 2  ;;  %v118_v56 = vsel %vm70_vm1, 1, %v1314_v4  ;;  %v562_v13 = vld.sshfl [vmem:[#allocation1 + $0x8] sm:$0xff pattern:$0x73625140] }
  0xc7   :  { %1206 = vst [vmem:[#allocation7 + $0xd0] sm:$0xff] %v1132_v51  ;;  %v1133_v57 = vsel %vm1049_vm2, %v805_v48, %v1034_v50  ;;  %v232_v38 = vperm.slane %v118_v56, 0  ;;  %v233_v58 = vperm.slane %v118_v56, 1  ;;  %v234_v36 = vperm.slane %v118_v56, 2 }
  0xc8   :  { %v1134_v46 = vsel %vm1051_vm3, %v1035_v52, %v1036_v53  ;;  %v235_v47 = vperm.slane %v118_v56, 3  ;;  %v236_v37 = vperm.slane %v118_v56, 4  ;;  %v237_v62 = vperm.slane %v118_v56, 5  ;;  %v563_v15 = vld.sshfl [vmem:[#allocation1 + $0x10] sm:$0xff pattern:$0x73625140] }
  0xc9   :  { %v1135_v41 = vsel %vm1053_vm4, %v1133_v57, %v1134_v46  ;;  %vm1872_vm13 = vcmp.eq.s32.totalorder %v232_v38, 1  ;;  %vm361_vm14 = vcmp.eq.s32.totalorder %v233_v58, 1  ;;  %vm362_vm15 = vcmp.eq.s32.totalorder %v234_v36, 1  ;;  %v564_v27 = vld.sshfl [vmem:[#allocation1 + $0x18] sm:$0xff pattern:$0x73625140] }
  0xca   :  { %1207 = vst [vmem:[#allocation7 + $0xd8] sm:$0xff] %v1135_v41  ;;  %vm363_vm0 = vcmp.eq.s32.totalorder %v235_v47, 1  ;;  %v809_v63 = vsel %vm1872_vm13, %v1825_v12, 0.0  ;;  %v810_v55 = vsel %vm361_vm14, %v1829_v61, 0.0  ;;  %v811_v44 = vsel %vm362_vm15, %v1831_v0, 0.0 }
  0xcb   :  { %v812_v45 = vsel %vm363_vm0, %v1834_v17, 0.0  ;;  %v1037_v1 = vrot.slane %v810_v55, 6  ;;  %v1038_v2 = vrot.slane %v811_v44, 4  ;;  %v238_v3 = vperm.slane %v118_v56, 6 }
  0xcc   :  { %v1039_v5 = vrot.slane %v812_v45, 2  ;;  %v239_v6 = vperm.slane %v118_v56, 7  ;;  %vm1882_vm1 = vcmp.eq.s32.totalorder %v236_v37, 1  ;;  %vm365_vm5 = vcmp.eq.s32.totalorder %v237_v62, 1 }
  0xcd   :  { %v1136_v11 = vsel %vm1049_vm2, %v809_v63, %v1037_v1  ;;  %vm366_vm6 = vcmp.eq.s32.totalorder %v238_v3, 1  ;;  %v813_v12 = vsel %vm1882_vm1, %v1836_v18, 0.0  ;;  %v814_v59 = vsel %vm365_vm5, %v1838_v9, 0.0  ;;  %v561_v17 = vld.sshfl [vmem:[#allocation1] sm:$0xff pattern:$0x73625140] }
  0xce   :  { %v1137_v60 = vsel %vm1051_vm3, %v1038_v2, %v1039_v5  ;;  %vm367_vm7 = vcmp.eq.s32.totalorder %v239_v6, 1  ;;  %v815_v8 = vsel %vm366_vm6, %v1840_v19, 0.0  ;;  %v1040_v61 = vrot.slane %v814_v59, 6  ;;  %v566_v34 = vld.sshfl [vmem:[#allocation1 + $0x28] sm:$0xff pattern:$0x73625140] }
  0xcf   :  { %v1138_v0 = vsel %vm1053_vm4, %v1136_v11, %v1137_v60  ;;  %v816_v14 = vsel %vm367_vm7, %v1842_v25, 0.0  ;;  %v1041_v16 = vrot.slane %v815_v8, 4  ;;  %vm71_vm8 = vcmp.ne.f32.partialorder %v55_v10, 0.0  ;;  %v568_v39 = vld.sshfl [vmem:[#allocation1 + $0x38] sm:$0xff pattern:$0x73625140] }
  0xd0   :  { %1208 = vst [vmem:[#allocation7 + $0xe0] sm:$0xff] %v1138_v0  ;;  %v1042_v26 = vrot.slane %v816_v14, 2  ;;  %v1139_v18 = vsel %vm1049_vm2, %v813_v12, %v1040_v61  ;;  %v119_v9 = vsel %vm71_vm8, 1, %v1314_v4  ;;  %v567_v4 = vld.sshfl [vmem:[#allocation1 + $0x30] sm:$0xff pattern:$0x73625140] }
  0xd1   :  { %v240_v28 = vperm.slane %v119_v9, 0  ;;  %v241_v24 = vperm.slane %v119_v9, 1  ;;  %v242_v19 = vperm.slane %v119_v9, 2  ;;  %v243_v29 = vperm.slane %v119_v9, 3 }
  0xd2   :  { %v1140_v30 = vsel %vm1051_vm3, %v1041_v16, %v1042_v26  ;;  %v244_v33 = vperm.slane %v119_v9, 4  ;;  %v245_v25 = vperm.slane %v119_v9, 5  ;;  %v246_v20 = vperm.slane %v119_v9, 6  ;;  %v565_v32 = vld.sshfl [vmem:[#allocation1 + $0x20] sm:$0xff pattern:$0x73625140] }
  0xd3   :  { %v1141_v22 = vsel %vm1053_vm4, %v1139_v18, %v1140_v30  ;;  %vm1899_vm9 = vcmp.eq.s32.totalorder %v240_v28, 1  ;;  %vm369_vm10 = vcmp.eq.s32.totalorder %v241_v24, 1  ;;  %vm370_vm11 = vcmp.eq.s32.totalorder %v242_v19, 1 }
  0xd4   :  { %1209 = vst [vmem:[#allocation7 + $0xe8] sm:$0xff] %v1141_v22  ;;  %vm371_vm12 = vcmp.eq.s32.totalorder %v243_v29, 1  ;;  %v817_v40 = vsel %vm1899_vm9, %v561_v17, 0.0  ;;  %v818_v43 = vsel %vm369_vm10, %v562_v13, 0.0  ;;  %v819_v31 = vsel %vm370_vm11, %v563_v15, 0.0 }
  0xd5   :  { %v820_v48 = vsel %vm371_vm12, %v564_v27, 0.0  ;;  %v1043_v35 = vrot.slane %v818_v43, 6  ;;  %v1044_v21 = vrot.slane %v819_v31, 4  ;;  %v247_v49 = vperm.slane %v119_v9, 7 }
  0xd6   :  { %v1045_v42 = vrot.slane %v820_v48, 2  ;;  %vm1905_vm13 = vcmp.eq.s32.totalorder %v244_v33, 1  ;;  %vm373_vm14 = vcmp.eq.s32.totalorder %v245_v25, 1  ;;  %vm374_vm15 = vcmp.eq.s32.totalorder %v246_v20, 1 }
  0xd7   :  { %v1142_v51 = vsel %vm1049_vm2, %v817_v40, %v1043_v35  ;;  %vm375_vm0 = vcmp.eq.s32.totalorder %v247_v49, 1  ;;  %v822_v52 = vsel %vm373_vm14, %v566_v34, 0.0  ;;  %v823_v56 = vsel %vm374_vm15, %v567_v4, 0.0 }
  0xd8   :  { %v1143_v53 = vsel %vm1051_vm3, %v1044_v21, %v1045_v42  ;;  %v824_v57 = vsel %vm375_vm0, %v568_v39, 0.0  ;;  %v1046_v38 = vrot.slane %v822_v52, 6  ;;  %v821_v36 = vsel %vm1905_vm13, %v565_v32, 0.0 }
  0xd9   :  { %v1144_v58 = vsel %vm1053_vm4, %v1142_v51, %v1143_v53  ;;  %v1047_v46 = vrot.slane %v823_v56, 4  ;;  %v1048_v47 = vrot.slane %v824_v57, 2 }
  0xda   :  { %1210 = vst [vmem:[#allocation7 + $0xf0] sm:$0xff] %v1144_v58  ;;  %v1145_v37 = vsel %vm1049_vm2, %v821_v36, %v1046_v38 }
  0xdb   :  { %v1146_v62 = vsel %vm1051_vm3, %v1047_v46, %v1048_v47 }
  0xdc   :  { %v1147_v41 = vsel %vm1053_vm4, %v1145_v37, %v1146_v62 }
  0xdd   :  { %1211 = vst [vmem:[#allocation7 + $0xf8] sm:$0xff] %v1147_v41 }
  0xde   :  { %1222 = dma.vmem_to_hbm [thread:$0]  %s1218_s1, 4096, %s1220_s21, [#allocation4]  }
  0xdf   :  { %1310 = dma.done.wait [#allocation4], 4096  }
  0xe0   :  { %1311 = vsyncadd [#allocation4], 4294963200 }
  0xe1   :  { %1227 = vsyncpa [#allocation3], 1 }
  0xe2   :  { %1228 = vsyncpa [#allocation6], 1 }
  0xe3   :  { %1229 = vsyncpa [#allocation4], 1 }

</bundles_post_ra>
